<compile_context>
chip_gen: v6e
topology: v6e:2x2x1
jax: 0.10.0
libtpu: 0.0.40
codegen_flags: <defaults>
</compile_context>

<pallas_src>
import jax
import jax.numpy as jnp
from jax.experimental import pallas as pl
from jax.experimental.pallas import tpu as pltpu

BN_EPS = 1e-5
LANE = 128
BTILE_ALIGN = 16  # bf16 sublane packing for the MXU LHS


def _round_up(n, m):
    return (n + m - 1) // m * m


def _mlp_kernel(x_ref, w1_ref, b1_ref, w2_ref, b2_ref, w3_ref, b3_ref, o_ref):
    cdt = w1_ref.dtype
    # x streams in as f32; cast to the MXU compute dtype in VMEM (saves an HBM pass)
    x = x_ref[...].astype(cdt)

    # block 1: Linear(+folded BN) -> ReLU (Dropout = identity in eval mode);
    # fuse bias+ReLU+downcast so the inter-layer activation lives as bf16.
    h = jnp.dot(x, w1_ref[...], preferred_element_type=jnp.float32)
    h = jnp.maximum(h + b1_ref[...], 0.0).astype(cdt)

    # block 2: Linear(+folded BN) -> ReLU
    h = jnp.dot(h, w2_ref[...], preferred_element_type=jnp.float32)
    h = jnp.maximum(h + b2_ref[...], 0.0).astype(cdt)

    # block 3: Linear -> Sigmoid.  sigmoid(z) = 0.5*(tanh(0.5*z)+1): single EUP op.
    logits = jnp.dot(h, w3_ref[...], preferred_element_type=jnp.float32) + b3_ref[...]
    o_ref[...] = (0.5 * (jnp.tanh(0.5 * logits) + 1.0)).astype(o_ref.dtype)


def fold_and_pad_params(params, compute_dtype=jnp.bfloat16):
    """Fold inference BatchNorm into the Linear layers, pad output dims to
    lane multiples (128), cast weights to the MXU compute dtype (biases f32)."""
    s1 = params["g1"] * jax.lax.rsqrt(params["v1"] + BN_EPS)
    w1 = params["w1"] * s1
    b1 = (params["b1"] - params["m1"]) * s1 + params["be1"]

    s2 = params["g2"] * jax.lax.rsqrt(params["v2"] + BN_EPS)
    w2 = params["w2"] * s2
    b2 = (params["b2"] - params["m2"]) * s2 + params["be2"]

    w3, b3 = params["w3"], params["b3"]

    H1, H2, L = w1.shape[1], w2.shape[1], w3.shape[1]
    H1p, H2p, Lp = (_round_up(d, LANE) for d in (H1, H2, L))

    # zero-padding is exact: padded hidden units stay 0 through bias/ReLU and
    # padded output columns are sliced off in the wrapper.
    w1 = jnp.pad(w1, ((0, 0), (0, H1p - H1)))
    b1 = jnp.pad(b1, ((0, 0), (0, H1p - H1)))
    w2 = jnp.pad(w2, ((0, H1p - H1), (0, H2p - H2)))
    b2 = jnp.pad(b2, ((0, 0), (0, H2p - H2)))
    w3 = jnp.pad(w3, ((0, H2p - H2), (0, Lp - L)))
    b3 = jnp.pad(b3, ((0, 0), (0, Lp - L)))

    return dict(
        w1=w1.astype(compute_dtype), b1=b1.astype(jnp.float32),
        w2=w2.astype(compute_dtype), b2=b2.astype(jnp.float32),
        w3=w3.astype(compute_dtype), b3=b3.astype(jnp.float32),
    )


def multilabel_classifier_forward(x, fused, num_labels, *, block_b=512):
    """x: (B, input_size) f32 (cast to bf16 inside the kernel).
    fused: output of fold_and_pad_params."""
    B, K = x.shape
    w1, b1 = fused["w1"], fused["b1"]
    w2, b2 = fused["w2"], fused["b2"]
    w3, b3 = fused["w3"], fused["b3"]
    H1p, H2p, Lp = w1.shape[1], w2.shape[1], w3.shape[1]
    cdt = w1.dtype
    isz = jnp.dtype(cdt).itemsize
    x_isz = jnp.dtype(x.dtype).itemsize

    # Per-device VMEM budget: 128 MiB on v5e/v6e, 64 MiB per TC on v7x.
    try:
        vmem_cap = int(pltpu.get_tpu_info().vmem_capacity_bytes)
    except Exception:
        vmem_cap = 64 << 20  # conservative fallback valid on all generations
    vmem_budget = max(vmem_cap - (8 << 20), 16 << 20)

    weight_bytes = ((K * H1p + H1p * H2p + H2p * Lp) * isz
                    + (H1p + H2p + Lp) * 4)

    def vmem_estimate(tb, weight_bufs):
        return (weight_bufs * weight_bytes        # resident weights/biases
                + 2 * tb * K * x_isz              # double-buffered f32 x tile
                + 2 * tb * Lp * 4                 # double-buffered f32 out tile
                + tb * (H1p + H2p) * isz          # bf16 inter-layer activations
                + tb * max(H1p, H2p, Lp) * 4)     # f32 matmul accumulator

    # batch tile: multiple of 16 (bf16 sublane packing); back off until it fits.
    tb = max(BTILE_ALIGN, _round_up(min(block_b, B), BTILE_ALIGN))
    while tb > BTILE_ALIGN and vmem_estimate(tb, 1) > vmem_budget:
        tb = max(BTILE_ALIGN, _round_up(tb // 2, BTILE_ALIGN))
    Bp = _round_up(B, tb)

    xp = x if Bp == B else jnp.pad(x, ((0, Bp - B), (0, 0)))

    def build(weight_mode, weight_bufs):
        def resident(shape):
            # full array, same block every grid step -> stays VMEM-resident
            return pl.BlockSpec(shape, lambda i: (0, 0), pipeline_mode=weight_mode)

        in_specs = [
            pl.BlockSpec((tb, K), lambda i: (i, 0)),          # x tile (pipelined)
            resident(w1.shape), resident(b1.shape),
            resident(w2.shape), resident(b2.shape),
            resident(w3.shape), resident(b3.shape),
        ]
        out_specs = pl.BlockSpec((tb, Lp), lambda i: (i, 0))  # lane-dense out tile

        est = vmem_estimate(tb, weight_bufs)
        vmem_limit = int(min(max(int(1.5 * est) + (4 << 20), 32 << 20), vmem_budget))

        return pl.pallas_call(
            _mlp_kernel,
            out_shape=jax.ShapeDtypeStruct((Bp, Lp), jnp.float32),
            grid=(Bp // tb,),
            in_specs=in_specs,
            out_specs=out_specs,
            compiler_params=pltpu.CompilerParams(
                dimension_semantics=("parallel",),  # shard batch tiles across TCs
                vmem_limit_bytes=vmem_limit,
            ),
        )

    try:
        # single-buffer the constant-index (resident) weights: halves their VMEM cost
        out = build(pl.Buffered(1), 1)(xp, w1, b1, w2, b2, w3, b3)
    except Exception:
        # fallback: default double-buffering for resident inputs
        out = build(None, 2)(xp, w1, b1, w2, b2, w3, b3)

    return out[:B, :num_labels]


def init_params(key, input_size, hidden_size, num_labels):
    h2 = hidden_size // 2
    ks = jax.random.split(key, 6)

    def linear(kw, kb, fan_in, fan_out):
        # PyTorch Linear init: U(-1/sqrt(fan_in), 1/sqrt(fan_in)); stored (in, out).
        bound = 1.0 / jnp.sqrt(fan_in)
        w = jax.random.uniform(kw, (fan_in, fan_out), jnp.float32, -bound, bound)
        b = jax.random.uniform(kb, (1, fan_out), jnp.float32, -bound, bound)
        return w, b

    w1, b1 = linear(ks[0], ks[1], input_size, hidden_size)
    w2, b2 = linear(ks[2], ks[3], hidden_size, h2)
    w3, b3 = linear(ks[4], ks[5], h2, num_labels)

    def bn(n):  # gamma, beta, running_mean, running_var (PyTorch defaults)
        return (jnp.ones((1, n), jnp.float32), jnp.zeros((1, n), jnp.float32),
                jnp.zeros((1, n), jnp.float32), jnp.ones((1, n), jnp.float32))

    g1, be1, m1, v1 = bn(hidden_size)
    g2, be2, m2, v2 = bn(h2)

    return dict(w1=w1, b1=b1, g1=g1, be1=be1, m1=m1, v1=v1,
                w2=w2, b2=b2, g2=g2, be2=be2, m2=m2, v2=v2,
                w3=w3, b3=b3)


if __name__ == "__main__":
    batch, input_size, hidden_size, num_labels = 8, 32, 32, 8

    key = jax.random.PRNGKey(0)
    kx, kp = jax.random.split(key)
    x = jax.random.normal(kx, (batch, input_size), jnp.float32)
    params = init_params(kp, input_size, hidden_size, num_labels)

    fused = fold_and_pad_params(params)
    out = multilabel_classifier_forward(x, fused, num_labels)
    out = jax.block_until_ready(out)

    # reference in plain f32 JAX (unfolded BN, exact sigmoid)
    def ref(xv, p):
        h = xv @ p["w1"] + p["b1"]
        h = (h - p["m1"]) / jnp.sqrt(p["v1"] + BN_EPS) * p["g1"] + p["be1"]
        h = jnp.maximum(h, 0.0)
        h = h @ p["w2"] + p["b2"]
        h = (h - p["m2"]) / jnp.sqrt(p["v2"] + BN_EPS) * p["g2"] + p["be2"]
        h = jnp.maximum(h, 0.0)
        return jax.nn.sigmoid(h @ p["w3"] + p["b3"])

    ref_out = ref(x, params)
    assert out.shape == (batch, num_labels)
    max_err = float(jnp.max(jnp.abs(out - ref_out)))
    assert max_err < 2e-2, max_err
    print("KERNEL_OK")
</pallas_src>

<mosaic_0001>
module attributes {stable_mosaic.version = 11 : i64} {
  func.func @_mlp_kernel(%arg0: i32, %arg1: memref<16x32xf32, #tpu.memory_space<vmem>>, %arg2: memref<32x128xbf16, #tpu.memory_space<vmem>>, %arg3: memref<1x128xf32, #tpu.memory_space<vmem>>, %arg4: memref<128x128xbf16, #tpu.memory_space<vmem>>, %arg5: memref<1x128xf32, #tpu.memory_space<vmem>>, %arg6: memref<128x128xbf16, #tpu.memory_space<vmem>>, %arg7: memref<1x128xf32, #tpu.memory_space<vmem>>, %arg8: memref<16x128xf32, #tpu.memory_space<vmem>>) attributes {dimension_semantics = [#tpu.dimension_semantics<parallel>], iteration_bounds = array<i64: 1>, scalar_prefetch = 0 : i64, scratch_operands = 0 : i64, tpu.core_type = #tpu.core_type<tc>, window_params = [{transform_indices = @transform_0, window_bounds = array<i64: 16, 32>}, {pipeline_mode = #tpu.pipeline_mode<synchronous>, transform_indices = @transform_1, window_bounds = array<i64: 32, 128>}, {pipeline_mode = #tpu.pipeline_mode<synchronous>, transform_indices = @transform_2, window_bounds = array<i64: 1, 128>}, {pipeline_mode = #tpu.pipeline_mode<synchronous>, transform_indices = @transform_3, window_bounds = array<i64: 128, 128>}, {pipeline_mode = #tpu.pipeline_mode<synchronous>, transform_indices = @transform_4, window_bounds = array<i64: 1, 128>}, {pipeline_mode = #tpu.pipeline_mode<synchronous>, transform_indices = @transform_5, window_bounds = array<i64: 128, 128>}, {pipeline_mode = #tpu.pipeline_mode<synchronous>, transform_indices = @transform_6, window_bounds = array<i64: 1, 128>}, {transform_indices = @transform_7, window_bounds = array<i64: 16, 128>}]} {
    %c0 = arith.constant 0 : index
    %c0_0 = arith.constant 0 : index
    %0 = vector.load %arg1[%c0, %c0_0] : memref<16x32xf32, #tpu.memory_space<vmem>>, vector<16x32xf32>
    %1 = arith.truncf %0 : vector<16x32xf32> to vector<16x32xbf16>
    %c0_1 = arith.constant 0 : index
    %c0_2 = arith.constant 0 : index
    %2 = vector.load %arg2[%c0_1, %c0_2] : memref<32x128xbf16, #tpu.memory_space<vmem>>, vector<32x128xbf16>
    %cst = arith.constant dense<0.000000e+00> : vector<16x128xf32>
    %3 = tpu.matmul %1, %2, %cst {dimension_numbers = #tpu.dot_dimension_numbers<[1], [0], [0], [1], [0, 0, 1, 1], [], []>} : vector<16x32xbf16>, vector<32x128xbf16>, vector<16x128xf32> -> vector<16x128xf32>
    %c0_3 = arith.constant 0 : index
    %c0_4 = arith.constant 0 : index
    %4 = vector.load %arg3[%c0_3, %c0_4] : memref<1x128xf32, #tpu.memory_space<vmem>>, vector<1x128xf32>
    %5 = vector.broadcast %4 : vector<1x128xf32> to vector<16x128xf32>
    %6 = arith.addf %3, %5 : vector<16x128xf32>
    %cst_5 = arith.constant 0.000000e+00 : f32
    %7 = vector.broadcast %cst_5 : f32 to vector<16x128xf32>
    %8 = arith.maximumf %6, %7 : vector<16x128xf32>
    %9 = arith.truncf %8 : vector<16x128xf32> to vector<16x128xbf16>
    %c0_6 = arith.constant 0 : index
    %c0_7 = arith.constant 0 : index
    %10 = vector.load %arg4[%c0_6, %c0_7] : memref<128x128xbf16, #tpu.memory_space<vmem>>, vector<128x128xbf16>
    %cst_8 = arith.constant dense<0.000000e+00> : vector<16x128xf32>
    %11 = tpu.matmul %9, %10, %cst_8 {dimension_numbers = #tpu.dot_dimension_numbers<[1], [0], [0], [1], [0, 0, 1, 1], [], []>} : vector<16x128xbf16>, vector<128x128xbf16>, vector<16x128xf32> -> vector<16x128xf32>
    %c0_9 = arith.constant 0 : index
    %c0_10 = arith.constant 0 : index
    %12 = vector.load %arg5[%c0_9, %c0_10] : memref<1x128xf32, #tpu.memory_space<vmem>>, vector<1x128xf32>
    %13 = vector.broadcast %12 : vector<1x128xf32> to vector<16x128xf32>
    %14 = arith.addf %11, %13 : vector<16x128xf32>
    %cst_11 = arith.constant 0.000000e+00 : f32
    %15 = vector.broadcast %cst_11 : f32 to vector<16x128xf32>
    %16 = arith.maximumf %14, %15 : vector<16x128xf32>
    %17 = arith.truncf %16 : vector<16x128xf32> to vector<16x128xbf16>
    %c0_12 = arith.constant 0 : index
    %c0_13 = arith.constant 0 : index
    %18 = vector.load %arg6[%c0_12, %c0_13] : memref<128x128xbf16, #tpu.memory_space<vmem>>, vector<128x128xbf16>
    %cst_14 = arith.constant dense<0.000000e+00> : vector<16x128xf32>
    %19 = tpu.matmul %17, %18, %cst_14 {dimension_numbers = #tpu.dot_dimension_numbers<[1], [0], [0], [1], [0, 0, 1, 1], [], []>} : vector<16x128xbf16>, vector<128x128xbf16>, vector<16x128xf32> -> vector<16x128xf32>
    %c0_15 = arith.constant 0 : index
    %c0_16 = arith.constant 0 : index
    %20 = vector.load %arg7[%c0_15, %c0_16] : memref<1x128xf32, #tpu.memory_space<vmem>>, vector<1x128xf32>
    %21 = vector.broadcast %20 : vector<1x128xf32> to vector<16x128xf32>
    %22 = arith.addf %19, %21 : vector<16x128xf32>
    %cst_17 = arith.constant 5.000000e-01 : f32
    %23 = vector.broadcast %cst_17 : f32 to vector<16x128xf32>
    %24 = arith.mulf %23, %22 : vector<16x128xf32>
    %25 = math.tanh %24 : vector<16x128xf32>
    %cst_18 = arith.constant 1.000000e+00 : f32
    %26 = vector.broadcast %cst_18 : f32 to vector<16x128xf32>
    %27 = arith.addf %25, %26 : vector<16x128xf32>
    %cst_19 = arith.constant 5.000000e-01 : f32
    %28 = vector.broadcast %cst_19 : f32 to vector<16x128xf32>
    %29 = arith.mulf %28, %27 : vector<16x128xf32>
    %c0_20 = arith.constant 0 : index
    %c0_21 = arith.constant 0 : index
    %30 = vector.load %arg8[%c0_20, %c0_21] : memref<16x128xf32, #tpu.memory_space<vmem>>, vector<16x128xf32>
    tpu.vector_store %arg8[%c0_20, %c0_21], %29 {strides = array<i32>} : memref<16x128xf32, #tpu.memory_space<vmem>>, vector<16x128xf32>,
    return
  }
  func.func @transform_0(%arg0: i32) -> (i32, i32) {
    %c0_i32 = arith.constant 0 : i32
    %c0_i32_0 = arith.constant 0 : i32
    return %arg0, %c0_i32 : i32, i32
  }
  func.func @transform_1(%arg0: i32) -> (i32, i32) {
    %c0_i32 = arith.constant 0 : i32
    %c0_i32_0 = arith.constant 0 : i32
    %c0_i32_1 = arith.constant 0 : i32
    return %c0_i32, %c0_i32_0 : i32, i32
  }
  func.func @transform_2(%arg0: i32) -> (i32, i32) {
    %c0_i32 = arith.constant 0 : i32
    %c0_i32_0 = arith.constant 0 : i32
    %c0_i32_1 = arith.constant 0 : i32
    return %c0_i32, %c0_i32_0 : i32, i32
  }
  func.func @transform_3(%arg0: i32) -> (i32, i32) {
    %c0_i32 = arith.constant 0 : i32
    %c0_i32_0 = arith.constant 0 : i32
    %c0_i32_1 = arith.constant 0 : i32
    return %c0_i32, %c0_i32_0 : i32, i32
  }
  func.func @transform_4(%arg0: i32) -> (i32, i32) {
    %c0_i32 = arith.constant 0 : i32
    %c0_i32_0 = arith.constant 0 : i32
    %c0_i32_1 = arith.constant 0 : i32
    return %c0_i32, %c0_i32_0 : i32, i32
  }
  func.func @transform_5(%arg0: i32) -> (i32, i32) {
    %c0_i32 = arith.constant 0 : i32
    %c0_i32_0 = arith.constant 0 : i32
    %c0_i32_1 = arith.constant 0 : i32
    return %c0_i32, %c0_i32_0 : i32, i32
  }
  func.func @transform_6(%arg0: i32) -> (i32, i32) {
    %c0_i32 = arith.constant 0 : i32
    %c0_i32_0 = arith.constant 0 : i32
    %c0_i32_1 = arith.constant 0 : i32
    return %c0_i32, %c0_i32_0 : i32, i32
  }
  func.func @transform_7(%arg0: i32) -> (i32, i32) {
    %c0_i32 = arith.constant 0 : i32
    %c0_i32_0 = arith.constant 0 : i32
    return %arg0, %c0_i32 : i32, i32
  }
}

module attributes {stable_mosaic.version = 11 : i64} {
  func.func @_mlp_kernel(%arg0: i32, %arg1: memref<16x32xf32, #tpu.memory_space<vmem>>, %arg2: memref<32x128xbf16, #tpu.memory_space<vmem>>, %arg3: memref<1x128xf32, #tpu.memory_space<vmem>>, %arg4: memref<128x128xbf16, #tpu.memory_space<vmem>>, %arg5: memref<1x128xf32, #tpu.memory_space<vmem>>, %arg6: memref<128x128xbf16, #tpu.memory_space<vmem>>, %arg7: memref<1x128xf32, #tpu.memory_space<vmem>>, %arg8: memref<16x128xf32, #tpu.memory_space<vmem>>) attributes {dimension_semantics = [#tpu.dimension_semantics<parallel>], iteration_bounds = array<i64: 1>, scalar_prefetch = 0 : i64, scratch_operands = 0 : i64, tpu.core_type = #tpu.core_type<tc>, window_params = [{transform_indices = @transform_0, window_bounds = array<i64: 16, 32>}, {pipeline_mode = #tpu.pipeline_mode<synchronous>, transform_indices = @transform_1, window_bounds = array<i64: 32, 128>}, {pipeline_mode = #tpu.pipeline_mode<synchronous>, transform_indices = @transform_2, window_bounds = array<i64: 1, 128>}, {pipeline_mode = #tpu.pipeline_mode<synchronous>, transform_indices = @transform_3, window_bounds = array<i64: 128, 128>}, {pipeline_mode = #tpu.pipeline_mode<synchronous>, transform_indices = @transform_4, window_bounds = array<i64: 1, 128>}, {pipeline_mode = #tpu.pipeline_mode<synchronous>, transform_indices = @transform_5, window_bounds = array<i64: 128, 128>}, {pipeline_mode = #tpu.pipeline_mode<synchronous>, transform_indices = @transform_6, window_bounds = array<i64: 1, 128>}, {transform_indices = @transform_7, window_bounds = array<i64: 16, 128>}]} {
    %c0 = arith.constant 0 : index
    %c0_0 = arith.constant 0 : index
    %0 = vector.load %arg1[%c0, %c0_0] : memref<16x32xf32, #tpu.memory_space<vmem>>, vector<16x32xf32>
    %1 = arith.truncf %0 : vector<16x32xf32> to vector<16x32xbf16>
    %c0_1 = arith.constant 0 : index
    %c0_2 = arith.constant 0 : index
    %2 = vector.load %arg2[%c0_1, %c0_2] : memref<32x128xbf16, #tpu.memory_space<vmem>>, vector<32x128xbf16>
    %cst = arith.constant dense<0.000000e+00> : vector<16x128xf32>
    %3 = tpu.matmul %1, %2, %cst {dimension_numbers = #tpu.dot_dimension_numbers<[1], [0], [0], [1], [0, 0, 1, 1], [], []>} : vector<16x32xbf16>, vector<32x128xbf16>, vector<16x128xf32> -> vector<16x128xf32>
    %c0_3 = arith.constant 0 : index
    %c0_4 = arith.constant 0 : index
    %4 = vector.load %arg3[%c0_3, %c0_4] : memref<1x128xf32, #tpu.memory_space<vmem>>, vector<1x128xf32>
    %5 = vector.broadcast %4 : vector<1x128xf32> to vector<16x128xf32>
    %6 = arith.addf %3, %5 : vector<16x128xf32>
    %cst_5 = arith.constant 0.000000e+00 : f32
    %7 = vector.broadcast %cst_5 : f32 to vector<16x128xf32>
    %8 = arith.maximumf %6, %7 : vector<16x128xf32>
    %9 = arith.truncf %8 : vector<16x128xf32> to vector<16x128xbf16>
    %c0_6 = arith.constant 0 : index
    %c0_7 = arith.constant 0 : index
    %10 = vector.load %arg4[%c0_6, %c0_7] : memref<128x128xbf16, #tpu.memory_space<vmem>>, vector<128x128xbf16>
    %cst_8 = arith.constant dense<0.000000e+00> : vector<16x128xf32>
    %11 = tpu.matmul %9, %10, %cst_8 {dimension_numbers = #tpu.dot_dimension_numbers<[1], [0], [0], [1], [0, 0, 1, 1], [], []>} : vector<16x128xbf16>, vector<128x128xbf16>, vector<16x128xf32> -> vector<16x128xf32>
    %c0_9 = arith.constant 0 : index
    %c0_10 = arith.constant 0 : index
    %12 = vector.load %arg5[%c0_9, %c0_10] : memref<1x128xf32, #tpu.memory_space<vmem>>, vector<1x128xf32>
    %13 = vector.broadcast %12 : vector<1x128xf32> to vector<16x128xf32>
    %14 = arith.addf %11, %13 : vector<16x128xf32>
    %cst_11 = arith.constant 0.000000e+00 : f32
    %15 = vector.broadcast %cst_11 : f32 to vector<16x128xf32>
    %16 = arith.maximumf %14, %15 : vector<16x128xf32>
    %17 = arith.truncf %16 : vector<16x128xf32> to vector<16x128xbf16>
    %c0_12 = arith.constant 0 : index
    %c0_13 = arith.constant 0 : index
    %18 = vector.load %arg6[%c0_12, %c0_13] : memref<128x128xbf16, #tpu.memory_space<vmem>>, vector<128x128xbf16>
    %cst_14 = arith.constant dense<0.000000e+00> : vector<16x128xf32>
    %19 = tpu.matmul %17, %18, %cst_14 {dimension_numbers = #tpu.dot_dimension_numbers<[1], [0], [0], [1], [0, 0, 1, 1], [], []>} : vector<16x128xbf16>, vector<128x128xbf16>, vector<16x128xf32> -> vector<16x128xf32>
    %c0_15 = arith.constant 0 : index
    %c0_16 = arith.constant 0 : index
    %20 = vector.load %arg7[%c0_15, %c0_16] : memref<1x128xf32, #tpu.memory_space<vmem>>, vector<1x128xf32>
    %21 = vector.broadcast %20 : vector<1x128xf32> to vector<16x128xf32>
    %22 = arith.addf %19, %21 : vector<16x128xf32>
    %cst_17 = arith.constant 5.000000e-01 : f32
    %23 = vector.broadcast %cst_17 : f32 to vector<16x128xf32>
    %24 = arith.mulf %23, %22 : vector<16x128xf32>
    %25 = math.tanh %24 : vector<16x128xf32>
    %cst_18 = arith.constant 1.000000e+00 : f32
    %26 = vector.broadcast %cst_18 : f32 to vector<16x128xf32>
    %27 = arith.addf %25, %26 : vector<16x128xf32>
    %cst_19 = arith.constant 5.000000e-01 : f32
    %28 = vector.broadcast %cst_19 : f32 to vector<16x128xf32>
    %29 = arith.mulf %28, %27 : vector<16x128xf32>
    %c0_20 = arith.constant 0 : index
    %c0_21 = arith.constant 0 : index
    %30 = vector.load %arg8[%c0_20, %c0_21] : memref<16x128xf32, #tpu.memory_space<vmem>>, vector<16x128xf32>
    tpu.vector_store %arg8[%c0_20, %c0_21], %29 {strides = array<i32>} : memref<16x128xf32, #tpu.memory_space<vmem>>, vector<16x128xf32>,
    return
  }
  func.func @transform_0(%arg0: i32) -> (i32, i32) {
    %c0_i32 = arith.constant 0 : i32
    %c0_i32_0 = arith.constant 0 : i32
    return %arg0, %c0_i32 : i32, i32
  }
  func.func @transform_1(%arg0: i32) -> (i32, i32) {
    %c0_i32 = arith.constant 0 : i32
    %c0_i32_0 = arith.constant 0 : i32
    %c0_i32_1 = arith.constant 0 : i32
    return %c0_i32, %c0_i32_0 : i32, i32
  }
  func.func @transform_2(%arg0: i32) -> (i32, i32) {
    %c0_i32 = arith.constant 0 : i32
    %c0_i32_0 = arith.constant 0 : i32
    %c0_i32_1 = arith.constant 0 : i32
    return %c0_i32, %c0_i32_0 : i32, i32
  }
  func.func @transform_3(%arg0: i32) -> (i32, i32) {
    %c0_i32 = arith.constant 0 : i32
    %c0_i32_0 = arith.constant 0 : i32
    %c0_i32_1 = arith.constant 0 : i32
    return %c0_i32, %c0_i32_0 : i32, i32
  }
  func.func @transform_4(%arg0: i32) -> (i32, i32) {
    %c0_i32 = arith.constant 0 : i32
    %c0_i32_0 = arith.constant 0 : i32
    %c0_i32_1 = arith.constant 0 : i32
    return %c0_i32, %c0_i32_0 : i32, i32
  }
  func.func @transform_5(%arg0: i32) -> (i32, i32) {
    %c0_i32 = arith.constant 0 : i32
    %c0_i32_0 = arith.constant 0 : i32
    %c0_i32_1 = arith.constant 0 : i32
    return %c0_i32, %c0_i32_0 : i32, i32
  }
  func.func @transform_6(%arg0: i32) -> (i32, i32) {
    %c0_i32 = arith.constant 0 : i32
    %c0_i32_0 = arith.constant 0 : i32
    %c0_i32_1 = arith.constant 0 : i32
    return %c0_i32, %c0_i32_0 : i32, i32
  }
  func.func @transform_7(%arg0: i32) -> (i32, i32) {
    %c0_i32 = arith.constant 0 : i32
    %c0_i32_0 = arith.constant 0 : i32
    return %arg0, %c0_i32 : i32, i32
  }
}

</mosaic_0001>

<bundles_post_ra>
// kernel: tpu_custom_call.1
= control target key start
LH: loop header
LB: loop body
LE: loop exit
PB: predicated region body
PF: predicated region fallthrough
CT: control target
= control target key end

     0   :  { %12 = vsyncpa [#allocation3], 0  ;;  %s759_s0 = inlined_call_operand.hbm [shape: f32[16,32], index: 0, kind: input, shape index: {}]   ;;  %s760_s1 = inlined_call_operand.hbm [shape: bf16[32,128], index: 1, kind: input, shape index: {}]   ;;  %s761_s2 = inlined_call_operand.vmem [shape: f32[1,128], index: 2, kind: input, shape index: {}]   ;;  %s762_s3 = inlined_call_operand.hbm [shape: bf16[128,128], index: 3, kind: input, shape index: {}]   ;;  %s763_s4 = inlined_call_operand.vmem [shape: f32[1,128], index: 4, kind: input, shape index: {}]   ;;  %s764_s5 = inlined_call_operand.hbm [shape: bf16[128,128], index: 5, kind: input, shape index: {}]   ;;  %s765_s6 = inlined_call_operand.vmem [shape: f32[1,128], index: 6, kind: input, shape index: {}]   ;;  %s766_s7 = inlined_call_operand.hbm [shape: f32[16,128], index: 7, kind: output, shape index: {}]  }
   0x1   :  { %13 = vsyncpa [#allocation6], 0 }
   0x2   :  { %14 = vsyncpa [#allocation9], 0 }
   0x3   :  { %15 = vsyncpa [#allocation4], 0  ;;  %s645_s24 = smov [#allocation5]  }
   0x4   :  { %s33_s25 = sshll.u32 %s645_s24, 4  ;;  %s34_s25 = int_to_ptr.vmem [resolvable:$true] %s33_s25 }
   0x5   :  { %s545_s26 = scalar_lea.vmem %s34_s25, 256  ;;  %p550_p1 = scmp.lt.s32.totalorder %s34_s25, %s34_s25 }
   0x6   :  { %p546_p0 = scmp.ne.s32.totalorder %s34_s25, %s545_s26  ;;  %p551_p2 = scmp.lt.s32.totalorder %s545_s26, %s545_s26 }
   0x8   :  { %p552_p3 = por %p551_p2, %p550_p1 }
   0xa   :  { %p553_p4 = pnand %p552_p3, %p546_p0 }
   0xc   :  { %556 = shalt.err (!%p553_p4)
}
   0xd   :  { %s646_s27 = smov 64   ;;  %s647_s28 = smov 4  }
   0xe   :  { %39 = dma.hbm_to_vmem [thread:$0]  %s760_s1, 256, %s34_s25, [#allocation6], %s646_s27, %s646_s27, %s647_s28  }
   0xf   :  { %s648_s8 = smov [#allocation2]  }
  0x10   :  { %s21_s9 = sshll.u32 %s648_s8, 4  ;;  %s22_s9 = int_to_ptr.vmem [resolvable:$true] %s21_s9 }
  0x11   :  { %s565_s10 = scalar_lea.vmem %s22_s9, 256  ;;  %p570_p6 = scmp.lt.s32.totalorder %s22_s9, %s22_s9 }
  0x12   :  { %p566_p5 = scmp.ne.s32.totalorder %s22_s9, %s565_s10  ;;  %p571_p7 = scmp.lt.s32.totalorder %s565_s10, %s565_s10 }
  0x14   :  { %p572_p8 = por %p571_p7, %p570_p6 }
  0x16   :  { %p573_p9 = pnand %p572_p8, %p566_p5 }
  0x18   :  { %576 = shalt.err (!%p573_p9)
}
  0x19   :  { %s649_s11 = smov 128   ;;  %s650_s12 = smov 8  }
  0x1a   :  { %27 = dma.hbm_to_vmem [thread:$0]  %s759_s0, 256, %s22_s9, [#allocation3], %s649_s11, %s649_s11, %s650_s12  }
  0x1b   :  { %s651_s1 = smov [#allocation7]   ;;  %s652_s16 = smov [#allocation8]  }
  0x1c   :  { %s47_s15 = sshll.u32 %s651_s1, 4  ;;  %s61_s17 = sshll.u32 %s652_s16, 4  ;;  %s48_s15 = int_to_ptr.vmem [resolvable:$true] %s47_s15  ;;  %s62_s17 = int_to_ptr.vmem [resolvable:$true] %s61_s17 }
  0x1d   :  { %s585_s18 = scalar_lea.vmem %s48_s15, 1024  ;;  %p590_p11 = scmp.lt.s32.totalorder %s48_s15, %s48_s15 }
  0x1e   :  { %p586_p10 = scmp.ne.s32.totalorder %s48_s15, %s585_s18  ;;  %p591_p12 = scmp.lt.s32.totalorder %s585_s18, %s585_s18 }
  0x20   :  { %p592_p13 = por %p591_p12, %p590_p11 }
  0x22   :  { %p593_p0 = pnand %p592_p13, %p586_p10 }
  0x24   :  { %596 = shalt.err (!%p593_p0)
}
  0x25   :  { %53 = dma.hbm_to_vmem [thread:$0]  %s762_s3, 1024, %s48_s15, [#allocation6], %s646_s27, %s646_s27, %s647_s28  }
  0x26   :  { %s605_s0 = scalar_lea.vmem %s62_s17, 1024  ;;  %p610_p2 = scmp.lt.s32.totalorder %s62_s17, %s62_s17 }
  0x27   :  { %p606_p1 = scmp.ne.s32.totalorder %s62_s17, %s605_s0  ;;  %p611_p3 = scmp.lt.s32.totalorder %s605_s0, %s605_s0 }
  0x29   :  { %p612_p4 = por %p611_p3, %p610_p2 }
  0x2b   :  { %p613_p5 = pnand %p612_p4, %p606_p1 }
  0x2d   :  { %616 = shalt.err (!%p613_p5)
}
  0x2e   :  { %67 = dma.hbm_to_vmem [thread:$0]  %s764_s5, 1024, %s62_s17, [#allocation9], %s646_s27, %s646_s27, %s647_s28  }
  0x2f   :  { %637 = dma.done.wait [#allocation3], 256  }
  0x30   :  { %638 = vsyncadd [#allocation3], 4294967040 }
  0x31   :  { %639 = dma.done.wait [#allocation6], 1280  }
  0x32   :  { %640 = vsyncadd [#allocation6], 4294966016 }
  0x33   :  { %641 = dma.done.wait [#allocation9], 1024  }
  0x34   :  { %642 = vsyncadd [#allocation9], 4294966272  ;;  %v653_v0 = vmov 0.0   ;;  %vm654_vm0 = vmmov 0   ;;  %v515_v1 = vld [vmem:[#allocation5 + $0x8] sm:$0xff]   ;;  %v516_v2 = vld [vmem:[#allocation5] sm:$0xff]  }
  0x35   :  { %456 = vmatprep.subr.bf16.mxu0 %v653_v0  ;;  %460 = vmatprep.mubr.msk.bf16.mxu0 %vm654_vm0, %v653_v0  ;;  %v83_v3 = vld [vmem:[#allocation2] sm:$0xff]  ;;  %v84_v4 = vld [vmem:[#allocation2 + $0x8] sm:$0xff]  ;;  %v517_v5 = vld [vmem:[#allocation7 + $0x38] sm:$0xff]   ;;  %vm109_vm1 = vcmask 261120  }
  0x36   :  { %464 = vmatprep.subr.bf16.mxu1 %v653_v0  ;;  %480 = vmatprep.mubr.msk.bf16.mxu1 %vm654_vm0, %v653_v0  ;;  %v85_v6 = vpack.c.bf16 %v84_v4, %v83_v3  ;;  %v518_v7 = vld [vmem:[#allocation7 + $0x30] sm:$0xff]   ;;  %v519_v8 = vld [vmem:[#allocation7 + $0x28] sm:$0xff]   ;;  %v520_v9 = vld [vmem:[#allocation7 + $0x20] sm:$0xff]  }
  0x37   :  { %457 = vmatpush3.bf16.msra.mxu0 %v515_v1  ;;  %465 = vmatpush3.bf16.msra.mxu1 %v517_v5  ;;  %v521_v10 = vld [vmem:[#allocation7 + $0x18] sm:$0xff]   ;;  %v522_v11 = vld [vmem:[#allocation7 + $0x10] sm:$0xff]   ;;  %v523_v12 = vld [vmem:[#allocation7 + $0x8] sm:$0xff]  }
  0x38   :  { %458 = vmatprep.subr.bf16.mxu0 %v653_v0  ;;  %466 = vmatprep.subr.bf16.mxu1 %v653_v0  ;;  %v524_v13 = vld [vmem:[#allocation7] sm:$0xff]   ;;  %v525_v14 = vld [vmem:[#allocation8 + $0x38] sm:$0xff]   ;;  %v526_v15 = vld [vmem:[#allocation8 + $0x30] sm:$0xff]  }
  0x39   :  { %v527_v16 = vld [vmem:[#allocation8 + $0x28] sm:$0xff]   ;;  %v528_v17 = vld [vmem:[#allocation8 + $0x20] sm:$0xff]   ;;  %v529_v18 = vld [vmem:[#allocation8 + $0x18] sm:$0xff]  }
  0x3a   :  { %v413_v19 = vld [vmem:[%s761_s2] ss:$0 sm:$0xff]  ;;  %v530_v29 = vld [vmem:[#allocation8 + $0x10] sm:$0xff]   ;;  %v531_v30 = vld [vmem:[#allocation8 + $0x8] sm:$0xff]  }
  0x3b   :  { %459 = vmatpush3.bf16.msra.mxu0 %v516_v2  ;;  %467 = vmatpush3.bf16.msra.mxu1 %v518_v7  ;;  %v532_v31 = vld [vmem:[#allocation8] sm:$0xff]  }
  0x3c   :  { %484 = vmatprep.subr.bf16.mxu0 %v653_v0  ;;  %468 = vmatprep.subr.bf16.mxu1 %v653_v0  ;;  %v417_v32 = vld [vmem:[%s763_s4] ss:$0 sm:$0xff]  ;;  %s655_s4 = smov [#allocation10]  }
  0x3d   :  { %v426_v42 = vld [vmem:[%s765_s6] ss:$0 sm:$0xff]  ;;  %s399_s26 = sshll.u32 %s655_s4, 4  ;;  %s400_s26 = int_to_ptr.vmem [resolvable:$true] %s399_s26 }
  0x3e   :  { %461 = vmatmul.mubr.msk.bf16.vlgmr.msra.gmra.mxu0 %vm109_vm1, %v85_v6  ;;  %s617_s6 = scalar_lea.vmem %s400_s26, 256  ;;  %p622_p7 = scmp.lt.s32.totalorder %s400_s26, %s400_s26 }
  0x3f   :  { %500 = vmatprep.mubr.msk.bf16.mxu0 %vm654_vm0, %v653_v0  ;;  %469 = vmatpush3.bf16.msra.mxu1 %v519_v8  ;;  %p618_p6 = scmp.ne.s32.totalorder %s400_s26, %s617_s6  ;;  %p623_p8 = scmp.lt.s32.totalorder %s617_s6, %s617_s6 }
  0x40   :  { %470 = vmatprep.subr.bf16.mxu1 %v653_v0  ;;  %485 = vmatpush3.bf16.msra.mxu0 %v525_v14 }
  0x41   :  { %486 = vmatprep.subr.bf16.mxu0 %v653_v0  ;;  %p624_p9 = por %p623_p8, %p622_p7 }
  0x43   :  { %471 = vmatpush3.bf16.msra.mxu1 %v520_v9  ;;  %p625_p10 = pnand %p624_p9, %p618_p6 }
  0x44   :  { %472 = vmatprep.subr.bf16.mxu1 %v653_v0  ;;  %487 = vmatpush3.bf16.msra.mxu0 %v526_v15 }
  0x45   :  { %488 = vmatprep.subr.bf16.mxu0 %v653_v0 }
  0x47   :  { %473 = vmatpush3.bf16.msra.mxu1 %v521_v10 }
  0x48   :  { %474 = vmatprep.subr.bf16.mxu1 %v653_v0  ;;  %489 = vmatpush3.bf16.msra.mxu0 %v527_v16 }
  0x49   :  { %490 = vmatprep.subr.bf16.mxu0 %v653_v0 }
  0x4b   :  { %475 = vmatpush3.bf16.msra.mxu1 %v522_v11 }
  0x4c   :  { %476 = vmatprep.subr.bf16.mxu1 %v653_v0  ;;  %491 = vmatpush3.bf16.msra.mxu0 %v528_v17 }
  0x4d   :  { %492 = vmatprep.subr.bf16.mxu0 %v653_v0 }
  0x4f   :  { %477 = vmatpush3.bf16.msra.mxu1 %v523_v12 }
  0x50   :  { %478 = vmatprep.subr.bf16.mxu1 %v653_v0  ;;  %493 = vmatpush3.bf16.msra.mxu0 %v529_v18 }
  0x51   :  { %494 = vmatprep.subr.bf16.mxu0 %v653_v0 }
  0x53   :  { %479 = vmatpush3.bf16.msra.mxu1 %v524_v13 }
  0x54   :  { %495 = vmatpush3.bf16.msra.mxu0 %v530_v29 }
  0x55   :  { %496 = vmatprep.subr.bf16.mxu0 %v653_v0 }
  0x58   :  { %497 = vmatpush3.bf16.msra.mxu0 %v531_v30 }
  0x59   :  { %498 = vmatprep.subr.bf16.mxu0 %v653_v0 }
  0x5c   :  { %499 = vmatpush3.bf16.msra.mxu0 %v532_v31 }
  0xfe   :  { %v147_v20 = vpop.f32.mrf.mxu0 }
  0xff   :  { %v148_v22 = vadd.f32 %v413_v19, %v147_v20 }
 0x100   :  { %v462_v21 = vpop.f32.mrf.mxu0 }
 0x101   :  { %v154_v26 = vmax.f32 %v148_v22, 0.0 }
 0x102   :  { %v150_v23 = vpop.f32.mrf.mxu0 }
 0x103   :  { %v151_v24 = vadd.f32 %v413_v19, %v150_v23 }
 0x104   :  { %v463_v25 = vpop.f32.mrf.mxu0 }
 0x105   :  { %v155_v27 = vmax.f32 %v151_v24, 0.0 }
 0x107   :  { %v156_v28 = vpack.c.bf16 %v155_v27, %v154_v26 }
 0x109   :  { %481 = vmatmul.mubr.bf16.vlgmr.msra.gmra.mxu1 %v156_v28 }
 0x1c9   :  { %v262_v33 = vpop.f32.mrf.mxu1 }
 0x1ca   :  { %v263_v35 = vadd.f32 %v417_v32, %v262_v33 }
 0x1cb   :  { %v482_v34 = vpop.f32.mrf.mxu1 }
 0x1cc   :  { %v269_v39 = vmax.f32 %v263_v35, 0.0 }
 0x1cd   :  { %v265_v36 = vpop.f32.mrf.mxu1 }
 0x1ce   :  { %v266_v37 = vadd.f32 %v417_v32, %v265_v36 }
 0x1cf   :  { %v483_v38 = vpop.f32.mrf.mxu1 }
 0x1d0   :  { %v270_v40 = vmax.f32 %v266_v37, 0.0 }
 0x1d2   :  { %v271_v41 = vpack.c.bf16 %v270_v40, %v269_v39 }
 0x1d4   :  { %501 = vmatmul.mubr.bf16.vlgmr.msra.gmra.mxu0 %v271_v41 }
 0x294   :  { %v377_v43 = vpop.f32.mrf.mxu0 }
 0x295   :  { %v378_v44 = vadd.f32 %v426_v42, %v377_v43 }
 0x296   :  { %v502_v45 = vpop.f32.mrf.mxu0 }
 0x297   :  { %v384_v46 = vmul.f32 0.5, %v378_v44 }
 0x298   :  { %v380_v47 = vpop.f32.mrf.mxu0 }
 0x299   :  { %533 = vtanh.f32 %v384_v46  ;;  %v381_v48 = vadd.f32 %v426_v42, %v380_v47 }
 0x29a   :  { %v503_v49 = vpop.f32.mrf.mxu0 }
 0x29b   :  { %v385_v50 = vmul.f32 0.5, %v381_v48 }
 0x29d   :  { %535 = vtanh.f32 %v385_v50 }
 0x2a6   :  { %v534_v51 = vpop.eup %533 }
 0x2a7   :  { %v388_v52 = vadd.f32 1.0, %v534_v51 }
 0x2a9   :  { %v390_v53 = vmul.f32 0.5, %v388_v52 }
 0x2aa   :  { %v536_v54 = vpop.eup %535 }
 0x2ab   :  { %v389_v55 = vadd.f32 1.0, %v536_v54  ;;  %392 = vst [vmem:[#allocation10] sm:$0xff] %v390_v53 }
 0x2ad   :  { %v391_v56 = vmul.f32 0.5, %v389_v55 }
 0x2af   :  { %393 = vst [vmem:[#allocation10 + $0x8] sm:$0xff] %v391_v56 }
 0x2b0   :  { %628 = shalt.err (!%p625_p10)
}
 0x2b1   :  { %405 = dma.vmem_to_hbm [thread:$0]  %s400_s26, 256, %s766_s7, [#allocation4], %s649_s11, %s649_s11, %s650_s12  }
 0x2b2   :  { %643 = dma.done.wait [#allocation4], 256  }
 0x2b3   :  { %644 = vsyncadd [#allocation4], 4294967040 }
 0x2b4   :  { %409 = vsyncpa [#allocation3], 1 }
 0x2b5   :  { %410 = vsyncpa [#allocation6], 1 }
 0x2b6   :  { %411 = vsyncpa [#allocation9], 1 }
 0x2b7   :  { %412 = vsyncpa [#allocation4], 1 }

// kernel: tpu_custom_call.1
= control target key start
LH: loop header
LB: loop body
LE: loop exit
PB: predicated region body
PF: predicated region fallthrough
CT: control target
= control target key end

     0   :  { %12 = vsyncpa [#allocation3], 0  ;;  %s759_s0 = inlined_call_operand.hbm [shape: f32[16,32], index: 0, kind: input, shape index: {}]   ;;  %s760_s1 = inlined_call_operand.hbm [shape: bf16[32,128], index: 1, kind: input, shape index: {}]   ;;  %s761_s2 = inlined_call_operand.vmem [shape: f32[1,128], index: 2, kind: input, shape index: {}]   ;;  %s762_s3 = inlined_call_operand.hbm [shape: bf16[128,128], index: 3, kind: input, shape index: {}]   ;;  %s763_s4 = inlined_call_operand.vmem [shape: f32[1,128], index: 4, kind: input, shape index: {}]   ;;  %s764_s5 = inlined_call_operand.hbm [shape: bf16[128,128], index: 5, kind: input, shape index: {}]   ;;  %s765_s6 = inlined_call_operand.vmem [shape: f32[1,128], index: 6, kind: input, shape index: {}]   ;;  %s766_s7 = inlined_call_operand.hbm [shape: f32[16,128], index: 7, kind: output, shape index: {}]  }
   0x1   :  { %13 = vsyncpa [#allocation6], 0 }
   0x2   :  { %14 = vsyncpa [#allocation9], 0 }
   0x3   :  { %15 = vsyncpa [#allocation4], 0  ;;  %s645_s24 = smov [#allocation5]  }
   0x4   :  { %s33_s25 = sshll.u32 %s645_s24, 4  ;;  %s34_s25 = int_to_ptr.vmem [resolvable:$true] %s33_s25 }
   0x5   :  { %s545_s26 = scalar_lea.vmem %s34_s25, 256  ;;  %p550_p1 = scmp.lt.s32.totalorder %s34_s25, %s34_s25 }
   0x6   :  { %p546_p0 = scmp.ne.s32.totalorder %s34_s25, %s545_s26  ;;  %p551_p2 = scmp.lt.s32.totalorder %s545_s26, %s545_s26 }
   0x8   :  { %p552_p3 = por %p551_p2, %p550_p1 }
   0xa   :  { %p553_p4 = pnand %p552_p3, %p546_p0 }
   0xc   :  { %556 = shalt.err (!%p553_p4)
}
   0xd   :  { %s646_s27 = smov 64   ;;  %s647_s28 = smov 4  }
   0xe   :  { %39 = dma.hbm_to_vmem [thread:$0]  %s760_s1, 256, %s34_s25, [#allocation6], %s646_s27, %s646_s27, %s647_s28  }
   0xf   :  { %s648_s8 = smov [#allocation2]  }
  0x10   :  { %s21_s9 = sshll.u32 %s648_s8, 4  ;;  %s22_s9 = int_to_ptr.vmem [resolvable:$true] %s21_s9 }
  0x11   :  { %s565_s10 = scalar_lea.vmem %s22_s9, 256  ;;  %p570_p6 = scmp.lt.s32.totalorder %s22_s9, %s22_s9 }
  0x12   :  { %p566_p5 = scmp.ne.s32.totalorder %s22_s9, %s565_s10  ;;  %p571_p7 = scmp.lt.s32.totalorder %s565_s10, %s565_s10 }
  0x14   :  { %p572_p8 = por %p571_p7, %p570_p6 }
  0x16   :  { %p573_p9 = pnand %p572_p8, %p566_p5 }
  0x18   :  { %576 = shalt.err (!%p573_p9)
}
  0x19   :  { %s649_s11 = smov 128   ;;  %s650_s12 = smov 8  }
  0x1a   :  { %27 = dma.hbm_to_vmem [thread:$0]  %s759_s0, 256, %s22_s9, [#allocation3], %s649_s11, %s649_s11, %s650_s12  }
  0x1b   :  { %s651_s1 = smov [#allocation7]   ;;  %s652_s16 = smov [#allocation8]  }
  0x1c   :  { %s47_s15 = sshll.u32 %s651_s1, 4  ;;  %s61_s17 = sshll.u32 %s652_s16, 4  ;;  %s48_s15 = int_to_ptr.vmem [resolvable:$true] %s47_s15  ;;  %s62_s17 = int_to_ptr.vmem [resolvable:$true] %s61_s17 }
  0x1d   :  { %s585_s18 = scalar_lea.vmem %s48_s15, 1024  ;;  %p590_p11 = scmp.lt.s32.totalorder %s48_s15, %s48_s15 }
  0x1e   :  { %p586_p10 = scmp.ne.s32.totalorder %s48_s15, %s585_s18  ;;  %p591_p12 = scmp.lt.s32.totalorder %s585_s18, %s585_s18 }
  0x20   :  { %p592_p13 = por %p591_p12, %p590_p11 }
  0x22   :  { %p593_p0 = pnand %p592_p13, %p586_p10 }
  0x24   :  { %596 = shalt.err (!%p593_p0)
}
  0x25   :  { %53 = dma.hbm_to_vmem [thread:$0]  %s762_s3, 1024, %s48_s15, [#allocation6], %s646_s27, %s646_s27, %s647_s28  }
  0x26   :  { %s605_s0 = scalar_lea.vmem %s62_s17, 1024  ;;  %p610_p2 = scmp.lt.s32.totalorder %s62_s17, %s62_s17 }
  0x27   :  { %p606_p1 = scmp.ne.s32.totalorder %s62_s17, %s605_s0  ;;  %p611_p3 = scmp.lt.s32.totalorder %s605_s0, %s605_s0 }
  0x29   :  { %p612_p4 = por %p611_p3, %p610_p2 }
  0x2b   :  { %p613_p5 = pnand %p612_p4, %p606_p1 }
  0x2d   :  { %616 = shalt.err (!%p613_p5)
}
  0x2e   :  { %67 = dma.hbm_to_vmem [thread:$0]  %s764_s5, 1024, %s62_s17, [#allocation9], %s646_s27, %s646_s27, %s647_s28  }
  0x2f   :  { %637 = dma.done.wait [#allocation3], 256  }
  0x30   :  { %638 = vsyncadd [#allocation3], 4294967040 }
  0x31   :  { %639 = dma.done.wait [#allocation6], 1280  }
  0x32   :  { %640 = vsyncadd [#allocation6], 4294966016 }
  0x33   :  { %641 = dma.done.wait [#allocation9], 1024  }
  0x34   :  { %642 = vsyncadd [#allocation9], 4294966272  ;;  %v653_v0 = vmov 0.0   ;;  %vm654_vm0 = vmmov 0   ;;  %v515_v1 = vld [vmem:[#allocation5 + $0x8] sm:$0xff]   ;;  %v516_v2 = vld [vmem:[#allocation5] sm:$0xff]  }
  0x35   :  { %456 = vmatprep.subr.bf16.mxu0 %v653_v0  ;;  %460 = vmatprep.mubr.msk.bf16.mxu0 %vm654_vm0, %v653_v0  ;;  %v83_v3 = vld [vmem:[#allocation2] sm:$0xff]  ;;  %v84_v4 = vld [vmem:[#allocation2 + $0x8] sm:$0xff]  ;;  %v517_v5 = vld [vmem:[#allocation7 + $0x38] sm:$0xff]   ;;  %vm109_vm1 = vcmask 261120  }
  0x36   :  { %464 = vmatprep.subr.bf16.mxu1 %v653_v0  ;;  %480 = vmatprep.mubr.msk.bf16.mxu1 %vm654_vm0, %v653_v0  ;;  %v85_v6 = vpack.c.bf16 %v84_v4, %v83_v3  ;;  %v518_v7 = vld [vmem:[#allocation7 + $0x30] sm:$0xff]   ;;  %v519_v8 = vld [vmem:[#allocation7 + $0x28] sm:$0xff]   ;;  %v520_v9 = vld [vmem:[#allocation7 + $0x20] sm:$0xff]  }
  0x37   :  { %457 = vmatpush3.bf16.msra.mxu0 %v515_v1  ;;  %465 = vmatpush3.bf16.msra.mxu1 %v517_v5  ;;  %v521_v10 = vld [vmem:[#allocation7 + $0x18] sm:$0xff]   ;;  %v522_v11 = vld [vmem:[#allocation7 + $0x10] sm:$0xff]   ;;  %v523_v12 = vld [vmem:[#allocation7 + $0x8] sm:$0xff]  }
  0x38   :  { %458 = vmatprep.subr.bf16.mxu0 %v653_v0  ;;  %466 = vmatprep.subr.bf16.mxu1 %v653_v0  ;;  %v524_v13 = vld [vmem:[#allocation7] sm:$0xff]   ;;  %v525_v14 = vld [vmem:[#allocation8 + $0x38] sm:$0xff]   ;;  %v526_v15 = vld [vmem:[#allocation8 + $0x30] sm:$0xff]  }
  0x39   :  { %v527_v16 = vld [vmem:[#allocation8 + $0x28] sm:$0xff]   ;;  %v528_v17 = vld [vmem:[#allocation8 + $0x20] sm:$0xff]   ;;  %v529_v18 = vld [vmem:[#allocation8 + $0x18] sm:$0xff]  }
  0x3a   :  { %v413_v19 = vld [vmem:[%s761_s2] ss:$0 sm:$0xff]  ;;  %v530_v29 = vld [vmem:[#allocation8 + $0x10] sm:$0xff]   ;;  %v531_v30 = vld [vmem:[#allocation8 + $0x8] sm:$0xff]  }
  0x3b   :  { %459 = vmatpush3.bf16.msra.mxu0 %v516_v2  ;;  %467 = vmatpush3.bf16.msra.mxu1 %v518_v7  ;;  %v532_v31 = vld [vmem:[#allocation8] sm:$0xff]  }
  0x3c   :  { %484 = vmatprep.subr.bf16.mxu0 %v653_v0  ;;  %468 = vmatprep.subr.bf16.mxu1 %v653_v0  ;;  %v417_v32 = vld [vmem:[%s763_s4] ss:$0 sm:$0xff]  ;;  %s655_s4 = smov [#allocation10]  }
  0x3d   :  { %v426_v42 = vld [vmem:[%s765_s6] ss:$0 sm:$0xff]  ;;  %s399_s26 = sshll.u32 %s655_s4, 4  ;;  %s400_s26 = int_to_ptr.vmem [resolvable:$true] %s399_s26 }
  0x3e   :  { %461 = vmatmul.mubr.msk.bf16.vlgmr.msra.gmra.mxu0 %vm109_vm1, %v85_v6  ;;  %s617_s6 = scalar_lea.vmem %s400_s26, 256  ;;  %p622_p7 = scmp.lt.s32.totalorder %s400_s26, %s400_s26 }
  0x3f   :  { %500 = vmatprep.mubr.msk.bf16.mxu0 %vm654_vm0, %v653_v0  ;;  %469 = vmatpush3.bf16.msra.mxu1 %v519_v8  ;;  %p618_p6 = scmp.ne.s32.totalorder %s400_s26, %s617_s6  ;;  %p623_p8 = scmp.lt.s32.totalorder %s617_s6, %s617_s6 }
  0x40   :  { %470 = vmatprep.subr.bf16.mxu1 %v653_v0  ;;  %485 = vmatpush3.bf16.msra.mxu0 %v525_v14 }
  0x41   :  { %486 = vmatprep.subr.bf16.mxu0 %v653_v0  ;;  %p624_p9 = por %p623_p8, %p622_p7 }
  0x43   :  { %471 = vmatpush3.bf16.msra.mxu1 %v520_v9  ;;  %p625_p10 = pnand %p624_p9, %p618_p6 }
  0x44   :  { %472 = vmatprep.subr.bf16.mxu1 %v653_v0  ;;  %487 = vmatpush3.bf16.msra.mxu0 %v526_v15 }
  0x45   :  { %488 = vmatprep.subr.bf16.mxu0 %v653_v0 }
  0x47   :  { %473 = vmatpush3.bf16.msra.mxu1 %v521_v10 }
  0x48   :  { %474 = vmatprep.subr.bf16.mxu1 %v653_v0  ;;  %489 = vmatpush3.bf16.msra.mxu0 %v527_v16 }
  0x49   :  { %490 = vmatprep.subr.bf16.mxu0 %v653_v0 }
  0x4b   :  { %475 = vmatpush3.bf16.msra.mxu1 %v522_v11 }
  0x4c   :  { %476 = vmatprep.subr.bf16.mxu1 %v653_v0  ;;  %491 = vmatpush3.bf16.msra.mxu0 %v528_v17 }
  0x4d   :  { %492 = vmatprep.subr.bf16.mxu0 %v653_v0 }
  0x4f   :  { %477 = vmatpush3.bf16.msra.mxu1 %v523_v12 }
  0x50   :  { %478 = vmatprep.subr.bf16.mxu1 %v653_v0  ;;  %493 = vmatpush3.bf16.msra.mxu0 %v529_v18 }
  0x51   :  { %494 = vmatprep.subr.bf16.mxu0 %v653_v0 }
  0x53   :  { %479 = vmatpush3.bf16.msra.mxu1 %v524_v13 }
  0x54   :  { %495 = vmatpush3.bf16.msra.mxu0 %v530_v29 }
  0x55   :  { %496 = vmatprep.subr.bf16.mxu0 %v653_v0 }
  0x58   :  { %497 = vmatpush3.bf16.msra.mxu0 %v531_v30 }
  0x59   :  { %498 = vmatprep.subr.bf16.mxu0 %v653_v0 }
  0x5c   :  { %499 = vmatpush3.bf16.msra.mxu0 %v532_v31 }
  0xfe   :  { %v147_v20 = vpop.f32.mrf.mxu0 }
  0xff   :  { %v148_v22 = vadd.f32 %v413_v19, %v147_v20 }
 0x100   :  { %v462_v21 = vpop.f32.mrf.mxu0 }
 0x101   :  { %v154_v26 = vmax.f32 %v148_v22, 0.0 }
 0x102   :  { %v150_v23 = vpop.f32.mrf.mxu0 }
 0x103   :  { %v151_v24 = vadd.f32 %v413_v19, %v150_v23 }
 0x104   :  { %v463_v25 = vpop.f32.mrf.mxu0 }
 0x105   :  { %v155_v27 = vmax.f32 %v151_v24, 0.0 }
 0x107   :  { %v156_v28 = vpack.c.bf16 %v155_v27, %v154_v26 }
 0x109   :  { %481 = vmatmul.mubr.bf16.vlgmr.msra.gmra.mxu1 %v156_v28 }
 0x1c9   :  { %v262_v33 = vpop.f32.mrf.mxu1 }
 0x1ca   :  { %v263_v35 = vadd.f32 %v417_v32, %v262_v33 }
 0x1cb   :  { %v482_v34 = vpop.f32.mrf.mxu1 }
 0x1cc   :  { %v269_v39 = vmax.f32 %v263_v35, 0.0 }
 0x1cd   :  { %v265_v36 = vpop.f32.mrf.mxu1 }
 0x1ce   :  { %v266_v37 = vadd.f32 %v417_v32, %v265_v36 }
 0x1cf   :  { %v483_v38 = vpop.f32.mrf.mxu1 }
 0x1d0   :  { %v270_v40 = vmax.f32 %v266_v37, 0.0 }
 0x1d2   :  { %v271_v41 = vpack.c.bf16 %v270_v40, %v269_v39 }
 0x1d4   :  { %501 = vmatmul.mubr.bf16.vlgmr.msra.gmra.mxu0 %v271_v41 }
 0x294   :  { %v377_v43 = vpop.f32.mrf.mxu0 }
 0x295   :  { %v378_v44 = vadd.f32 %v426_v42, %v377_v43 }
 0x296   :  { %v502_v45 = vpop.f32.mrf.mxu0 }
 0x297   :  { %v384_v46 = vmul.f32 0.5, %v378_v44 }
 0x298   :  { %v380_v47 = vpop.f32.mrf.mxu0 }
 0x299   :  { %533 = vtanh.f32 %v384_v46  ;;  %v381_v48 = vadd.f32 %v426_v42, %v380_v47 }
 0x29a   :  { %v503_v49 = vpop.f32.mrf.mxu0 }
 0x29b   :  { %v385_v50 = vmul.f32 0.5, %v381_v48 }
 0x29d   :  { %535 = vtanh.f32 %v385_v50 }
 0x2a6   :  { %v534_v51 = vpop.eup %533 }
 0x2a7   :  { %v388_v52 = vadd.f32 1.0, %v534_v51 }
 0x2a9   :  { %v390_v53 = vmul.f32 0.5, %v388_v52 }
 0x2aa   :  { %v536_v54 = vpop.eup %535 }
 0x2ab   :  { %v389_v55 = vadd.f32 1.0, %v536_v54  ;;  %392 = vst [vmem:[#allocation10] sm:$0xff] %v390_v53 }
 0x2ad   :  { %v391_v56 = vmul.f32 0.5, %v389_v55 }
 0x2af   :  { %393 = vst [vmem:[#allocation10 + $0x8] sm:$0xff] %v391_v56 }
 0x2b0   :  { %628 = shalt.err (!%p625_p10)
}
 0x2b1   :  { %405 = dma.vmem_to_hbm [thread:$0]  %s400_s26, 256, %s766_s7, [#allocation4], %s649_s11, %s649_s11, %s650_s12  }
 0x2b2   :  { %643 = dma.done.wait [#allocation4], 256  }
 0x2b3   :  { %644 = vsyncadd [#allocation4], 4294967040 }
 0x2b4   :  { %409 = vsyncpa [#allocation3], 1 }
 0x2b5   :  { %410 = vsyncpa [#allocation6], 1 }
 0x2b6   :  { %411 = vsyncpa [#allocation9], 1 }
 0x2b7   :  { %412 = vsyncpa [#allocation4], 1 }

</bundles_post_ra>
